<compile_context>
chip_gen: v7x
topology: tpu7x:2x2x1
jax: 0.10.0
libtpu: 0.0.40
codegen_flags: <defaults>
</compile_context>

<pallas_src>
import jax
import jax.numpy as jnp
from jax import lax
from jax.experimental import pallas as pl
from jax.experimental.pallas import tpu as pltpu


def _round_up(x, m):
    return (x + m - 1) // m * m


def _conv3x3_kernel(x_ref, w_ref, b_ref, o_ref):
    """One (batch, row-tile, E-tile) grid step.

    x_ref: (1, TH, W, 9C) bf16   im2col slab tile
    w_ref: (9C, E_pad)    bf16   full fused weight, resident in VMEM
    b_ref: (1, E_pad)     f32    full bias, resident in VMEM
    o_ref: (1, TH, W, TE)        output tile (TE multiple of 128)
    """
    _, TH, W, K = x_ref.shape
    TE = o_ref.shape[-1]

    # 128-aligned lane offset of this E-tile inside the resident weight/bias.
    e0 = pl.multiple_of(pl.program_id(2) * TE, 128)

    # Single K=9C matmul; (1,TH,W,9C)->(TH*W,9C) is a contiguous merge.
    lhs = x_ref[...].reshape(TH * W, K)
    acc = jnp.dot(lhs, w_ref[:, pl.ds(e0, TE)],
                  preferred_element_type=jnp.float32)
    # Epilogue: fused bias add + cast, one store of the tile.
    acc = acc + b_ref[:, pl.ds(e0, TE)]
    o_ref[...] = acc.reshape(1, TH, W, TE).astype(o_ref.dtype)


def patch_embed(x_nchw, weight_oihw, bias, *, th=8, te=128, out_dtype=None):
    """Equivalent of PatchEmbed.forward (Conv2d k=3, padding=1, stride=1).

    x_nchw:      (B, C, H, W)
    weight_oihw: (E, C, 3, 3)   (PyTorch Conv2d weight layout)
    bias:        (E,)
    returns:     (B, E, H, W)

    th: output rows per tile (largest divisor of H <= th is used).
    te: embed-dim tile, multiple of 128 (128 on v5e, 256 on v6e/v7x).
    out_dtype: output dtype (default: x dtype). Use bf16 in fused pipelines.
    """
    B, C, H, W = x_nchw.shape
    E = weight_oihw.shape[0]
    out_dtype = x_nchw.dtype if out_dtype is None else out_dtype

    # Largest divisor of H that is <= th (never fall back to th = H).
    th = max(1, min(th, H))
    while H % th != 0:
        th -= 1
    te = min(te, _round_up(E, 128))
    E_pad = _round_up(E, te)
    n_h = H // th
    n_e = E_pad // te
    K = 9 * C

    # ---- glue (plain JAX): layout, halo pad, bf16 cast, full 3x3 im2col ----
    # slab[b, i, j, (ky*3+kx)*C + c] = x_pad[b, i+ky, j+kx, c]
    x_nhwc = jnp.transpose(x_nchw, (0, 2, 3, 1)).astype(jnp.bfloat16)
    x_pad = jnp.pad(x_nhwc, ((0, 0), (1, 1), (1, 1), (0, 0)))      # (B,H+2,W+2,C)
    slab = jnp.concatenate(
        [x_pad[:, ky:ky + H, kx:kx + W, :] for ky in range(3) for kx in range(3)],
        axis=-1)                                                    # (B,H,W,9C)

    # Weights: OIHW -> [(ky*3+kx)*C + c, e], zero-padded along E to E_pad.
    w_fused = jnp.transpose(weight_oihw, (2, 3, 1, 0)).reshape(K, E)
    w_fused = jnp.pad(w_fused, ((0, 0), (0, E_pad - E))).astype(jnp.bfloat16)
    b_pad = jnp.pad(bias.astype(jnp.float32), (0, E_pad - E)).reshape(1, E_pad)

    # VMEM budget derived from the actual tiles (double-buffered slab/out,
    # single resident weight/bias) + headroom; clamp to sane per-chip limits.
    out_isz = jnp.dtype(out_dtype).itemsize
    vmem_bytes = (2 * th * W * K * 2          # slab tiles (bf16, 2 buffers)
                  + 2 * th * W * te * out_isz  # out tiles (2 buffers)
                  + K * E_pad * 2              # resident fused weight
                  + E_pad * 4)                 # resident bias
    vmem_limit = min(max(int(vmem_bytes * 2) + (2 << 20), 16 << 20), 96 << 20)

    out_nhwc = pl.pallas_call(
        _conv3x3_kernel,
        out_shape=jax.ShapeDtypeStruct((B, H, W, E_pad), out_dtype),
        grid=(B, n_h, n_e),
        in_specs=[
            # Slab block index independent of e (innermost), so each row-tile
            # is DMA'd once per (b, h) regardless of how many E tiles there are.
            pl.BlockSpec((1, th, W, K), lambda b, h, e: (b, h, 0, 0)),
            # Constant index map -> weight/bias fetched once, resident in VMEM.
            pl.BlockSpec((K, E_pad), lambda b, h, e: (0, 0)),
            pl.BlockSpec((1, E_pad), lambda b, h, e: (0, 0)),
        ],
        out_specs=pl.BlockSpec((1, th, W, te), lambda b, h, e: (b, h, 0, e)),
        compiler_params=pltpu.CompilerParams(
            dimension_semantics=("parallel", "parallel", "arbitrary"),
            vmem_limit_bytes=vmem_limit,
        ),
    )(slab, w_fused, b_pad)

    if E_pad != E:
        out_nhwc = out_nhwc[..., :E]
    # NCHW return only to match the PyTorch interface; a fused AFNO pipeline
    # would keep NHWC and drop this transpose.
    return jnp.transpose(out_nhwc, (0, 3, 1, 2))                    # (B,E,H,W)


if __name__ == "__main__":
    key = jax.random.PRNGKey(0)
    k_x, k_w, k_b = jax.random.split(key, 3)

    B, C, H, W = 2, 4, 16, 16
    E = 32  # embed_dim

    x = jax.random.normal(k_x, (B, C, H, W), dtype=jnp.float32)
    weight = jax.random.normal(k_w, (E, C, 3, 3), dtype=jnp.float32) * 0.1
    bias = jax.random.normal(k_b, (E,), dtype=jnp.float32) * 0.1

    y = patch_embed(x, weight, bias)
    y = jax.block_until_ready(y)

    # Reference matched to the kernel's numerics (bf16 inputs, f32 accumulate):
    # cast inputs to bf16-exact f32 values, then run XLA's conv.
    x_q = x.astype(jnp.bfloat16).astype(jnp.float32)
    w_q = weight.astype(jnp.bfloat16).astype(jnp.float32)
    y_ref = lax.conv_general_dilated(
        x_q, w_q, window_strides=(1, 1), padding=((1, 1), (1, 1)),
        dimension_numbers=("NCHW", "OIHW", "NCHW")) + bias[None, :, None, None]
    y_ref = jax.block_until_ready(y_ref)

    assert y.shape == (B, E, H, W)
    err = jnp.max(jnp.abs(y - y_ref))
    assert err < 2e-3, f"max abs err {err}"

    print("KERNEL_OK")
</pallas_src>

<mosaic_0001>
module attributes {stable_mosaic.version = 11 : i64} {
  func.func @_conv3x3_kernel(%arg0: i32, %arg1: i32, %arg2: i32, %arg3: memref<1x8x16x36xbf16, #tpu.memory_space<vmem>>, %arg4: memref<36x128xbf16, #tpu.memory_space<vmem>>, %arg5: memref<1x128xf32, #tpu.memory_space<vmem>>, %arg6: memref<1x8x16x128xf32, #tpu.memory_space<vmem>>) attributes {dimension_semantics = [#tpu.dimension_semantics<parallel>, #tpu.dimension_semantics<parallel>, #tpu.dimension_semantics<arbitrary>], iteration_bounds = array<i64: 2, 2, 1>, scalar_prefetch = 0 : i64, scratch_operands = 0 : i64, tpu.core_type = #tpu.core_type<tc>, window_params = [{transform_indices = @transform_0, window_bounds = array<i64: 1, 8, 16, 36>}, {pipeline_mode = #tpu.pipeline_mode<synchronous>, transform_indices = @transform_1, window_bounds = array<i64: 36, 128>}, {pipeline_mode = #tpu.pipeline_mode<synchronous>, transform_indices = @transform_2, window_bounds = array<i64: 1, 128>}, {transform_indices = @transform_3, window_bounds = array<i64: 1, 8, 16, 128>}]} {
    %c128_i32 = arith.constant 128 : i32
    %0 = arith.muli %arg2, %c128_i32 : i32
    %1 = tpu.assume_multiple %0, 128 : i32
    %c0 = arith.constant 0 : index
    %c0_0 = arith.constant 0 : index
    %c0_1 = arith.constant 0 : index
    %c0_2 = arith.constant 0 : index
    %2 = vector.load %arg3[%c0, %c0_0, %c0_1, %c0_2] : memref<1x8x16x36xbf16, #tpu.memory_space<vmem>>, vector<1x8x16x36xbf16>
    %3 = vector.shape_cast %2 : vector<1x8x16x36xbf16> to vector<128x36xbf16>
    %c0_3 = arith.constant 0 : index
    %4 = arith.index_cast %1 : i32 to index
    %5 = vector.load %arg4[%c0_3, %4] : memref<36x128xbf16, #tpu.memory_space<vmem>>, vector<36x128xbf16>
    %cst = arith.constant dense<0.000000e+00> : vector<128x128xf32>
    %6 = tpu.matmul %3, %5, %cst {dimension_numbers = #tpu.dot_dimension_numbers<[1], [0], [0], [1], [0, 0, 1, 1], [], []>} : vector<128x36xbf16>, vector<36x128xbf16>, vector<128x128xf32> -> vector<128x128xf32>
    %c0_4 = arith.constant 0 : index
    %7 = arith.index_cast %1 : i32 to index
    %8 = vector.load %arg5[%c0_4, %7] : memref<1x128xf32, #tpu.memory_space<vmem>>, vector<1x128xf32>
    %9 = vector.broadcast %8 : vector<1x128xf32> to vector<128x128xf32>
    %10 = arith.addf %6, %9 : vector<128x128xf32>
    %11 = vector.shape_cast %10 : vector<128x128xf32> to vector<1x8x16x128xf32>
    %c0_5 = arith.constant 0 : index
    %c0_6 = arith.constant 0 : index
    %c0_7 = arith.constant 0 : index
    %c0_8 = arith.constant 0 : index
    %12 = vector.load %arg6[%c0_5, %c0_6, %c0_7, %c0_8] : memref<1x8x16x128xf32, #tpu.memory_space<vmem>>, vector<1x8x16x128xf32>
    tpu.vector_store %arg6[%c0_5, %c0_6, %c0_7, %c0_8], %11 {strides = array<i32>} : memref<1x8x16x128xf32, #tpu.memory_space<vmem>>, vector<1x8x16x128xf32>,
    return
  }
  func.func @transform_0(%arg0: i32, %arg1: i32, %arg2: i32) -> (i32, i32, i32, i32) {
    %c0_i32 = arith.constant 0 : i32
    %c0_i32_0 = arith.constant 0 : i32
    %c0_i32_1 = arith.constant 0 : i32
    return %arg0, %arg1, %c0_i32, %c0_i32_0 : i32, i32, i32, i32
  }
  func.func @transform_1(%arg0: i32, %arg1: i32, %arg2: i32) -> (i32, i32) {
    %c0_i32 = arith.constant 0 : i32
    %c0_i32_0 = arith.constant 0 : i32
    %c0_i32_1 = arith.constant 0 : i32
    return %c0_i32, %c0_i32_0 : i32, i32
  }
  func.func @transform_2(%arg0: i32, %arg1: i32, %arg2: i32) -> (i32, i32) {
    %c0_i32 = arith.constant 0 : i32
    %c0_i32_0 = arith.constant 0 : i32
    %c0_i32_1 = arith.constant 0 : i32
    return %c0_i32, %c0_i32_0 : i32, i32
  }
  func.func @transform_3(%arg0: i32, %arg1: i32, %arg2: i32) -> (i32, i32, i32, i32) {
    %c0_i32 = arith.constant 0 : i32
    %c0_i32_0 = arith.constant 0 : i32
    return %arg0, %arg1, %c0_i32, %arg2 : i32, i32, i32, i32
  }
}

</mosaic_0001>

<bundles_post_ra>
// kernel: tpu_custom_call.1
= control target key start
LH: loop header
LB: loop body
LE: loop exit
PB: predicated region body
PF: predicated region fallthrough
CT: control target
= control target key end

     0   :  { %s1258_s0 = inlined_call_operand.hbm [shape: bf16[2,16,16,36], index: 0, kind: input, shape index: {}]   ;;  %s1259_s1 = inlined_call_operand.hbm [shape: bf16[36,128], index: 1, kind: input, shape index: {}]   ;;  %s1260_s2 = inlined_call_operand.vmem [shape: f32[1,128], index: 2, kind: input, shape index: {}]   ;;  %s1261_s3 = inlined_call_operand.hbm [shape: f32[2,16,16,128], index: 3, kind: output, shape index: {}]  }
   0x1   :  { %1272 = sst [smem:[#allocation15_spill]] %s1259_s1 }
   0x2   :  { %8 = vsyncpa [#allocation3], 0 }
   0x3   :  { %10 = vsyncpa [#allocation3 + $0x1], 0 }
   0x4   :  { %11 = vsyncpa [#allocation6], 0 }
   0x5   :  { %12 = vsyncpa [#allocation4], 0 }
   0x6   :  { %14 = vsyncpa [#allocation4 + $0x1], 0  ;;  %s968_s12 = smov 0   ;;  %s970_s13 = smov 0  }
   0x7   :  { %s972_s14 = smov 0   ;;  %s974_s15 = smov 0  }
   0x8   :  { %s976_s16 = smov 0   ;;  %s978_s17 = smov 0  }
   0x9   :  { %s980_s18 = smov 0   ;;  %s982_s19 = smov 0  }
   0xa LB: > { %1273 = sst [smem:[#allocation11_spill]] %s931_s17  ;;  %s591_s20 = sadd.s32 4294967295, %s939_s19   ;;  %s939_s19 = sphi %s982_s19, %s20_s19   ;;  %s935_s18 = sphi %s980_s18, %s1302_s18   ;;  %s931_s17 = sphi %s978_s17, %s1296_s17   ;;  %s927_s16 = sphi %s976_s16, %s1301_s16   ;;  %s923_s15 = sphi %s974_s15, %s1295_s15   ;;  %s919_s14 = sphi %s972_s14, %s1300_s14   ;;  %s915_s13 = sphi %s970_s13, %s1299_s13   ;;  %s911_s12 = sphi %s968_s12, %s1298_s12  }
   0xb   : > { %s592_s21 = sadd.s32 4294967294, %s939_s19   ;;  %p61_p0 = scmp.ne.s32.totalorder %s915_s13, %s911_s12 }
   0xc   : > { %p1012_p1 = scmp.eq.s32.totalorder %s591_s20, 0  ;;  %p1016_p2 = scmp.eq.s32.totalorder %s591_s20, 3 }
   0xd   : > { %p137_p3 = scmp.eq.s32.totalorder %s592_s21, 3  ;;  %p593_p5 = scmp.ge.s32.totalorder %s939_s19, 1 }
   0xe   : > { %s1274_s22 = scalar_select %p1012_p1, 1, 0 }
   0xf   : > { %s1275_s23 = scalar_select %p1016_p2, 1, 0 }
  0x10   : > { %p1022_p4 = por %p1012_p1, %p61_p0  ;;  %p1027_p6 = por %p137_p3, %p61_p0 }
  0x11   : > { %p144_p7 = scmp.lt.s32.totalorder %s939_s19, 5  ;;  %s941_s27 = smov [#allocation5]  }
  0x12   : > { %s1276_s24 = scalar_select %p1022_p4, 1, 0 }
  0x13   : > { %s1277_s25 = scalar_select %p1027_p6, 1, 0 }
  0x14   : > { %p1032_p8 = pnand %p593_p5, %p144_p7  ;;  %s156_s28 = sshll.u32 %s941_s27, 4  ;;  %s157_s28 = int_to_ptr.vmem [resolvable:$true] %s156_s28 }
  0x15   : > { %1278 = sst [smem:[#allocation12_spill]] %s1277_s25  ;;  %s1281_s1 = sld [smem:[#allocation15_spill]] }
  0x16   : > { %s1279_s26 = scalar_select %p1032_p8, 1, 0 }
  0x17   : > { %p683_p9 = pneg %p1032_p8 }
  0x19   : > { %p1040_p10 = pnand %p683_p9, %p1012_p1 }
  0x1b   : > { %s779_s5 = scalar_lea.hbm %s1281_s1, 320  ;;  %p781_p12 = pneg %p1040_p10 }
  0x1c   : > { %p780_p11 = scmp.ne.s32.totalorder %s1281_s1, %s779_s5  ;;  %p786_p3 = scmp.lt.u32.totalorder %s779_s5, %s1281_s1 }
  0x1e   : > { %p782_p13 = pnand %p781_p12, %p780_p11 }
  0x20   : > { %p783_p0 = pneg %p782_p13 }
  0x22   : > { %p788_p5 = pnand %p786_p3, %p783_p0 }
  0x24   : > { %791 = shalt.err (!%p788_p5)
}
  0x25   : > { %s792_s10 = scalar_lea.vmem %s157_s28, 320  ;;  %p800_p1 = scmp.lt.s32.totalorder %s157_s28, %s157_s28 }
  0x26   : > { %p793_p7 = scmp.ne.s32.totalorder %s157_s28, %s792_s10  ;;  %p801_p4 = scmp.lt.s32.totalorder %s792_s10, %s792_s10 }
  0x28   : > { %p795_p9 = pnand %p793_p7, %p781_p12  ;;  %p802_p8 = por %p801_p4, %p800_p1 }
  0x2a   : > { %p796_p6 = pneg %p795_p9 }
  0x2c   : > { %p803_p2 = pnand %p802_p8, %p796_p6 }
  0x2e   : > { %806 = shalt.err (!%p803_p2)
}
  0x2f   : > { %s1266_s11 = smov 64   ;;  %s1267_s20 = smov 4  }
  0x30   : > { %686 = dma.hbm_to_vmem [thread:$0]  (!%p1040_p10), %s1281_s1, 320, %s157_s28, [#allocation6], %s1266_s11, %s1266_s11, %s1267_s20  }
  0x31   : > { %s35_s30 = sadd.s32 1, %s931_s17  ;;  %s39_s4 = sadd.s32 1, %s935_s18 }
  0x32   : > { %p37_p1 = scmp.ge.s32.totalorder %s35_s30, 2  ;;  %s48_s5 = sadd.s32 1, %s919_s14 }
  0x33   : > { %p55_p2 = scmp.ne.s32.totalorder %s919_s14, %s915_s13  ;;  %p56_p4 = scmp.eq.s32.totalorder %s939_s19, 0 }
  0x34   : > { %s1304_s30 = smov (%p37_p1, %s35_s30), 0  ;;  %s1306_s4 = smov (!%p37_p1, %s39_s4), %s935_s18 }
  0x35   : > { %1282 = sst [smem:[#allocation13_spill]] %s1304_s30  ;;  %s44_s29 = ssub.s32 %s931_s17, %s1304_s30 }
  0x36   : > { %p41_p6 = scmp.ge.s32.totalorder %s1306_s4, 2  ;;  %p1283_p8 = scmp.ne.s32.totalorder %s1275_s23, 0 }
  0x37   : > { %p1080_p10 = por %p56_p4, %p55_p2  ;;  %p696_p12 = scmp.lt.s32.totalorder %s939_s19, 4 }
  0x38   : > { %p1076_p11 = por %p1283_p8, %p55_p2  ;;  %s1308_s4 = smov (%p41_p6, %s1306_s4), 0 }
  0x39   : > { %1286 = sst [smem:[#allocation14_spill]] %s1308_s4  ;;  %s173_s7 = sand.u32 1, %s919_s14  }
  0x3a   : > { %s632_s8 = sshll.u32 %s931_s17, 4  ;;  %s43_s9 = ssub.s32 %s935_s18, %s1308_s4 }
  0x3b   : > { %s45_s10 = sor.u32 %s44_s29, %s43_s9  ;;  %s596_s21 = sshll.u32 %s173_s7, 6 }
  0x3c   : > { %p46_p13 = scmp.eq.s32.totalorder %s45_s10, 0  ;;  %s599_s23 = sshll.u32 %s935_s18, 5 }
  0x3d   : > { %s177_s27 = scalar_lea.vmem [#allocation2], %s596_s21  ;;  %s184_s1 = sadd.s32 %s632_s8, %s599_s23 }
  0x3e   : > { %s187_s11 = sshll.u32 %s177_s27, 4  ;;  %s600_s30 = sshll.u32 %s184_s1, 6  ;;  %s1095_s11 = int_to_ptr.vmem [resolvable:$true] %s187_s11 }
  0x3f   : > { %s1093_s20 = scalar_select %p46_p13, %s919_s14, %s48_s5  }
  0x40   : > { %p1101_p0 = pnand %p696_p12, %p1080_p10  ;;  %s1108_s29 = scalar_lea.hbm %s1258_s0, %s600_s30 }
  0x41   : > { %s1110_s5 = scalar_lea.sflag [#allocation3], %s173_s7  ;;  %s807_s1 = scalar_lea.hbm %s1108_s29, 1024 }
  0x42   : > { %p808_p3 = scmp.ne.s32.totalorder %s1108_s29, %s807_s1  ;;  %p809_p5 = pneg %p1101_p0 }
  0x43   : > { %s812_s4 = scalar_lea.hbm %s1258_s0, 4096  ;;  %p813_p1 = scmp.lt.u32.totalorder %s1108_s29, %s1258_s0 }
  0x44   : > { %p810_p7 = pnand %p809_p5, %p808_p3  ;;  %p814_p2 = scmp.lt.u32.totalorder %s812_s4, %s807_s1 }
  0x45   : > { %p816_p6 = scmp.lt.u32.totalorder %s807_s1, %s1108_s29 }
  0x46   : > { %p811_p9 = pneg %p810_p7  ;;  %p815_p4 = por %p814_p2, %p813_p1 }
  0x48   : > { %p817_p8 = por %p816_p6, %p815_p4 }
  0x4a   : > { %p818_p10 = pnand %p817_p8, %p811_p9 }
  0x4c   : > { %821 = shalt.err (!%p818_p10)
}
  0x4d   : > { %s822_s7 = scalar_lea.vmem %s1095_s11, 1024  ;;  %s944_s9 = smov [#allocation2]  }
  0x4e   : > { %p823_p12 = scmp.ne.s32.totalorder %s1095_s11, %s822_s7  ;;  %s827_s10 = sshll.u32 %s944_s9, 4  ;;  %s828_s10 = int_to_ptr.vmem [resolvable:$false] %s827_s10 }
  0x4f   : > { %s829_s21 = scalar_lea.vmem %s828_s10, 2048  ;;  %p830_p7 = scmp.lt.s32.totalorder %s1095_s11, %s828_s10 }
  0x50   : > { %p825_p13 = pnand %p823_p12, %p809_p5  ;;  %p831_p1 = scmp.lt.s32.totalorder %s829_s21, %s822_s7 }
  0x52   : > { %p826_p3 = pneg %p825_p13  ;;  %p832_p2 = por %p831_p1, %p830_p7 }
  0x54   : > { %p833_p4 = pnand %p832_p2, %p826_p3 }
  0x56   : > { %836 = shalt.err (!%p833_p4)
}
  0x57   : > { %s1288_s23 = smov 4   ;;  %s1289_s27 = smov 64  }
  0x58   : > { %690 = dma.hbm_to_vmem [thread:$0]  (!%p1101_p0), %s1108_s29, 1024, %s1095_s11, %s1110_s5, %s1289_s27, %s1289_s27, %s1288_s23  }
  0x59   : > { %p1290_p5 = scmp.ne.s32.totalorder %s1279_s26, 0 }
  0x5a   : > { %s1144_s1 = sand.u32 (!%p1290_p5), 1, %s915_s13   ;;  %p1291_p9 = scmp.ne.s32.totalorder (!%p1290_p5), %s1276_s24, 0 }
  0x5b   : > { %199 = sbr.rel (%p1290_p5) target bundleno = 355 (0x163), region = 32  ;;  %s602_s28 = sshll.u32 (!%p1290_p5), %s1144_s1, 6 }
  0x5c   : > { %s202_s17 = scalar_lea.sflag (!%p1290_p5), [#allocation3], %s1144_s1  ;;  %s1148_s4 = scalar_lea.vmem (!%p1290_p5), [#allocation2], %s602_s28 }
  0x62   : > { %898 = dma.done.wait (%p1291_p9), %s202_s17, 1024  }
  0x63   : > { %900 = vsyncadd (%p1291_p9), %s202_s17, 4294966272  ;;  %p1292_p0 = scmp.ne.s32.totalorder %s1274_s22, 0 }
  0x65   : > { %902 = dma.done.wait (%p1292_p0), [#allocation6], 320  }
  0x66   : > { %904 = vsyncadd (%p1292_p0), [#allocation6], 4294966976  ;;  %v768_v0 = vld [vmem:[#allocation5] sm:$0xff]   ;;  %v769_v1 = vld [vmem:[#allocation5 + $0x8] sm:$0xff]   ;;  %vm324_vm0 = vcmask 293888   ;;  %vm349_vm1 = vcmask 1041408  }
  0x67   : > { %645 = vmatprep.subr.bf16.mxu0 %v768_v0  ;;  %667 = vmatprep.subr.bf16.mxu1 %v768_v0  ;;  %v770_v2 = vld [vmem:[#allocation5 + $0x10] ss:$0 sps:$4 sm:$0x33]   ;;  %v771_v3 = vld [vmem:[%s1148_s4] sm:$0xff]   ;;  %v773_v6 = vld [vmem:[%s1148_s4 + $0x8] sm:$0xff]   ;;  %s604_s22 = sshll.u32 %s1144_s1, 7 }
  0x68   : > { %646 = vmatpush3.bf16.msra.mxu0 %v768_v0  ;;  %670 = vmatpush3.bf16.msra.mxu1 %v768_v0  ;;  %v772_v4 = vld [vmem:[%s1148_s4 + $0x20] sm:$0xff]   ;;  %v351_v5 = vsel %vm349_vm1, %v770_v2, 0  ;;  %v774_v7 = vld [vmem:[%s1148_s4 + $0x28] sm:$0xff]   ;;  %v775_v8 = vld [vmem:[%s1148_s4 + $0x10] sm:$0xff]   ;;  %s633_s26 = sshll.u32 %s923_s15, 4  ;;  %s628_s11 = sshll.u32 %s927_s16, 5 }
  0x69   : > { %647 = vmatprep.subr.bf16.mxu0 %v769_v1  ;;  %668 = vmatprep.subr.bf16.mxu1 %v769_v1  ;;  %v776_v9 = vld [vmem:[%s1148_s4 + $0x30] sm:$0xff]   ;;  %v777_v10 = vld [vmem:[%s1148_s4 + $0x18] sm:$0xff]   ;;  %v605_v12 = vld [vmem:[%s1260_s2] ss:$0 sm:$0xff]  ;;  %s1180_s29 = scalar_lea.vmem [#allocation7], %s604_s22  ;;  %s481_s15 = sadd.s32 %s633_s26, %s628_s11 }
  0x6a   : > { %651 = vmatprep.mubr.msk.bf16.mxu0 %vm324_vm0, %v771_v3  ;;  %659 = vmatprep.mubr.msk.bf16.mxu1 %vm324_vm0, %v772_v4  ;;  %v778_v11 = vld [vmem:[%s1148_s4 + $0x38] sm:$0xff]   ;;  %s629_s16 = sshll.u32 %s481_s15, 7  ;;  %s484_s5 = sshll.u32 %s1180_s29, 4  ;;  %s1198_s5 = int_to_ptr.vmem [resolvable:$true] %s484_s5 }
  0x6b   : > { %s1196_s7 = scalar_lea.hbm %s1261_s3, %s629_s16  ;;  %s467_s9 = scalar_lea.sflag [#allocation4], %s1144_s1 }
  0x6c   : > { %648 = vmatpush3.bf16.msra.mxu0 %v769_v1  ;;  %671 = vmatpush3.bf16.msra.mxu1 %v769_v1  ;;  %s837_s10 = scalar_lea.vmem %s1198_s5, 2048  ;;  %s945_s21 = smov [#allocation7]  }
  0x6d   : > { %673 = vmatprep.subr.msk.bf16.mxu0 %vm349_vm1, %v770_v2  ;;  %674 = vmatprep.subr.msk.bf16.mxu1 %vm349_vm1, %v770_v2  ;;  %p838_p6 = scmp.ne.s32.totalorder %s1198_s5, %s837_s10  ;;  %s841_s23 = sshll.u32 %s945_s21, 4  ;;  %s842_s23 = int_to_ptr.vmem [resolvable:$false] %s841_s23 }
  0x6e   : > { %s843_s27 = scalar_lea.vmem %s842_s23, 4096  ;;  %p844_p12 = scmp.lt.s32.totalorder %s1198_s5, %s842_s23 }
  0x6f   : > { %p839_p8 = pnand %p838_p6, %p1076_p11  ;;  %p845_p13 = scmp.lt.s32.totalorder %s843_s27, %s837_s10 }
  0x70   : > { %650 = vmatpush3.bf16.msra.mxu0 %v351_v5  ;;  %672 = vmatpush3.bf16.msra.mxu1 %v351_v5 }
  0x71   : > { %p840_p10 = pneg %p839_p8  ;;  %p846_p3 = por %p845_p13, %p844_p12 }
  0x73   : > { %652 = vmatmul.mubr.msk.bf16.vlgmr.msra.gmra.mrb[0].mxu0 %vm324_vm0, %v773_v6  ;;  %660 = vmatmul.mubr.msk.bf16.vlgmr.msra.gmra.mrb[0].mxu1 %vm324_vm0, %v774_v7  ;;  %p847_p7 = pnand %p846_p3, %p840_p10 }
  0x74   : > { %655 = vmatprep.mubr.msk.bf16.mxu0 %vm324_vm0, %v775_v8  ;;  %663 = vmatprep.mubr.msk.bf16.mxu1 %vm324_vm0, %v776_v9 }
  0x7b   : > { %656 = vmatmul.mubr.msk.bf16.gmra.mrb[4].mxu0 %vm324_vm0, %v777_v10  ;;  %664 = vmatmul.mubr.msk.bf16.gmra.mrb[4].mxu1 %vm324_vm0, %v778_v11 }
 0x146   : > { %v653_v13 = vpop.f32.mrb[0].mxu0  ;;  %v661_v14 = vpop.f32.mrb[0].mxu1 }
 0x147   : > { %v396_v15 = vadd.f32 %v653_v13, %v605_v12  ;;  %v428_v16 = vadd.f32 %v661_v14, %v605_v12  ;;  %v387_v17 = vpop.f32.mrb[1].mxu0  ;;  %v419_v18 = vpop.f32.mrb[1].mxu1 }
 0x148   : > { %v388_v19 = vadd.f32 %v605_v12, %v387_v17  ;;  %v420_v20 = vadd.f32 %v605_v12, %v419_v18  ;;  %v654_v21 = vpop.f32.mrb[2].mxu0  ;;  %v662_v22 = vpop.f32.mrb[2].mxu1 }
 0x149   : > { %452 = vst [vmem:[%s1180_s29 + $0x10] sm:$0xff] %v396_v15  ;;  %460 = vst [vmem:[%s1180_s29 + $0x50] sm:$0xff] %v428_v16  ;;  %v399_v23 = vadd.f32 %v654_v21, %v605_v12  ;;  %v431_v24 = vadd.f32 %v662_v22, %v605_v12  ;;  %v390_v25 = vpop.f32.mrb[3].mxu0  ;;  %v422_v26 = vpop.f32.mrb[3].mxu1 }
 0x14a   : > { %450 = vst [vmem:[%s1180_s29] sm:$0xff] %v388_v19  ;;  %458 = vst [vmem:[%s1180_s29 + $0x40] sm:$0xff] %v420_v20  ;;  %v391_v27 = vadd.f32 %v605_v12, %v390_v25  ;;  %v423_v28 = vadd.f32 %v605_v12, %v422_v26 }
 0x14b   : > { %453 = vst [vmem:[%s1180_s29 + $0x18] sm:$0xff] %v399_v23  ;;  %461 = vst [vmem:[%s1180_s29 + $0x58] sm:$0xff] %v431_v24 }
 0x14c   : > { %451 = vst [vmem:[%s1180_s29 + $0x8] sm:$0xff] %v391_v27  ;;  %459 = vst [vmem:[%s1180_s29 + $0x48] sm:$0xff] %v423_v28 }
 0x14e   : > { %v657_v29 = vpop.f32.mrb[4].mxu0  ;;  %v665_v30 = vpop.f32.mrb[4].mxu1 }
 0x14f   : > { %v412_v31 = vadd.f32 %v657_v29, %v605_v12  ;;  %v444_v32 = vadd.f32 %v665_v30, %v605_v12  ;;  %v403_v33 = vpop.f32.mrb[5].mxu0  ;;  %v435_v34 = vpop.f32.mrb[5].mxu1 }
 0x150   : > { %v404_v35 = vadd.f32 %v605_v12, %v403_v33  ;;  %v436_v36 = vadd.f32 %v605_v12, %v435_v34  ;;  %v658_v37 = vpop.f32.mrb[6].mxu0  ;;  %v666_v38 = vpop.f32.mrb[6].mxu1 }
 0x151   : > { %456 = vst [vmem:[%s1180_s29 + $0x30] sm:$0xff] %v412_v31  ;;  %464 = vst [vmem:[%s1180_s29 + $0x70] sm:$0xff] %v444_v32  ;;  %v415_v39 = vadd.f32 %v658_v37, %v605_v12  ;;  %v447_v40 = vadd.f32 %v666_v38, %v605_v12  ;;  %v406_v41 = vpop.f32.mrb[7].mxu0  ;;  %v438_v42 = vpop.f32.mrb[7].mxu1 }
 0x152   : > { %454 = vst [vmem:[%s1180_s29 + $0x20] sm:$0xff] %v404_v35  ;;  %462 = vst [vmem:[%s1180_s29 + $0x60] sm:$0xff] %v436_v36  ;;  %v407_v43 = vadd.f32 %v605_v12, %v406_v41  ;;  %v439_v44 = vadd.f32 %v605_v12, %v438_v42 }
 0x153   : > { %457 = vst [vmem:[%s1180_s29 + $0x38] sm:$0xff] %v415_v39  ;;  %465 = vst [vmem:[%s1180_s29 + $0x78] sm:$0xff] %v447_v40 }
 0x154   : > { %455 = vst [vmem:[%s1180_s29 + $0x28] sm:$0xff] %v407_v43  ;;  %463 = vst [vmem:[%s1180_s29 + $0x68] sm:$0xff] %v439_v44 }
 0x155   : > { %850 = shalt.err (!%p847_p7)
}
 0x156   : > { %s851_s28 = scalar_lea.hbm %s1196_s7, 2048  ;;  %s855_s22 = scalar_lea.hbm %s1261_s3, 8192 }
 0x157   : > { %p852_p1 = scmp.ne.s32.totalorder %s1196_s7, %s851_s28  ;;  %p856_p5 = scmp.lt.u32.totalorder %s1196_s7, %s1261_s3 }
 0x158   : > { %p857_p9 = scmp.lt.u32.totalorder %s855_s22, %s851_s28  ;;  %p859_p6 = scmp.lt.u32.totalorder %s851_s28, %s1196_s7 }
 0x159   : > { %p853_p2 = pnand %p852_p1, %p1076_p11 }
 0x15a   : > { %p858_p0 = por %p857_p9, %p856_p5 }
 0x15b   : > { %p854_p4 = pneg %p853_p2 }
 0x15c   : > { %p860_p8 = por %p859_p6, %p858_p0 }
 0x15e   : > { %p861_p10 = pnand %p860_p8, %p854_p4 }
 0x160   : > { %864 = shalt.err (!%p861_p10)
}
 0x161   : > { %s946_s26 = smov 128   ;;  %s947_s11 = smov 8  }
 0x162   : > { %681 = dma.vmem_to_hbm [thread:$0]  (%p1076_p11), %s1198_s5, 2048, %s1196_s7, %s467_s9, %s946_s26, %s946_s26, %s947_s11  }
 0x163 PF: > { %s1293_s29 = sld [smem:[#allocation12_spill]]  ;;  %p698_p12 = scmp.ge.s32.totalorder %s939_s19, 2 }
 0x164   : > { %s499_s15 = sand.u32 1, %s911_s12  }
 0x165   : > { %s500_s16 = scalar_lea.sflag [#allocation4], %s499_s15 }
 0x169   : > { %p1294_p13 = scmp.ne.s32.totalorder %s1293_s29, 0 }
 0x16b   : > { %p692_p3 = pnand %p698_p12, %p1294_p13 }
 0x16d   : > { %906 = dma.done.wait (!%p692_p3), %s500_s16, 2048  }
 0x16e   : > { %908 = vsyncadd (!%p692_p3), %s500_s16, 4294965248  ;;  %s20_s19 = sadd.s32 1, %s939_s19   ;;  %s1295_s15 = sld [smem:[#allocation11_spill]] }
 0x16f   : > { %p17_p7 = scmp.ge.s32.totalorder %s20_s19, 6   ;;  %s1296_s17 = sld [smem:[#allocation13_spill]] }
 0x170   : > { %s1297_s6 = sld [smem:[#allocation14_spill]]  ;;  %s1298_s12 = smov %s915_s13 }
 0x171   : > { %s1299_s13 = smov %s919_s14  ;;  %s1300_s14 = smov %s1093_s20 }
 0x172   : > { %s1301_s16 = smov %s935_s18  ;;  %19 = sbr.rel (!%p17_p7) target bundleno = 10 (0xa), region = 83 }
 0x176   : > { %s1302_s18 = smov %s1297_s6 }
 0x179   :  { %505 = vsyncpa [#allocation3], 1 }
 0x17a   :  { %507 = vsyncpa [#allocation3 + $0x1], 1 }
 0x17b   :  { %508 = vsyncpa [#allocation6], 1 }
 0x17c   :  { %509 = vsyncpa [#allocation4], 1 }
 0x17d   :  { %511 = vsyncpa [#allocation4 + $0x1], 1 }

</bundles_post_ra>
